<compile_context>
chip_gen: v6e
topology: v6e:2x2x1
jax: 0.10.0
libtpu: 0.0.40
codegen_flags: <defaults>
</compile_context>

<pallas_src>
import functools

import jax
import jax.numpy as jnp
from jax.experimental import pallas as pl
from jax.experimental.pallas import tpu as pltpu


def _round_up(x, m):
    return ((x + m - 1) // m) * m


def _label_smoothing_kernel(pred_ref, tgt_ref, loss_ref, *,
                            num_classes, smoothing, total_rows):
    """One batch tile.

    pred_ref: VMEM [TB, C]  logits, native dtype (cast to f32 here)
    tgt_ref : VMEM [TB, 1]  int32 class ids
    loss_ref: VMEM [TB, 1]  f32 per-row loss (0 for padded rows)
    """
    i = pl.program_id(0)
    pred = pred_ref[...].astype(jnp.float32)           # [TB, C]
    tb, c = pred.shape

    # log_softmax pieces (numerically stable); log_prob itself is never built.
    row_max = jnp.max(pred, axis=1, keepdims=True)      # [TB, 1]  (XLU)
    shifted = pred - row_max                            # [TB, C]
    lse = jnp.log(jnp.sum(jnp.exp(shifted), axis=1, keepdims=True))  # [TB, 1]

    sum_shifted = jnp.sum(shifted, axis=1, keepdims=True)            # [TB, 1]

    # shifted logit at the target class, via one-hot select + row reduction.
    # (out-of-range ids simply get no one-hot match, same as the previous kernel)
    col_ids = jax.lax.broadcasted_iota(jnp.int32, (tb, c), dimension=1)
    onehot = col_ids == tgt_ref[...]                    # [TB, C] (broadcast [TB, 1])
    shifted_at_tgt = jnp.sum(jnp.where(onehot, shifted, 0.0),
                             axis=1, keepdims=True)     # [TB, 1]

    confidence = jnp.float32(1.0 - smoothing)
    off_value = jnp.float32(smoothing / (num_classes - 1))

    # -sum_c smooth_target * log_prob, without materializing either [TB, C] array:
    #   = -( off*(sum_c shifted - C*lse) + (conf - off)*(shifted[tgt] - lse) )
    per_row = -(off_value * (sum_shifted - jnp.float32(c) * lse)
                + (confidence - off_value) * (shifted_at_tgt - lse))  # [TB, 1]

    # Mask rows of a ragged last tile (B % TB != 0): they must contribute 0.
    row_ids = i * tb + jax.lax.broadcasted_iota(jnp.int32, (tb, 1), dimension=0)
    loss_ref[...] = jnp.where(row_ids < total_rows, per_row, jnp.float32(0.0))


def label_smoothing_loss(pred, target, *, num_classes, smoothing=0.1,
                         block_rows=256):
    """Pallas wrapper. pred: [B, C] float (any dtype), target: [B] int -> f32 scalar."""
    B, C = pred.shape
    assert C == num_classes
    # Do NOT upcast pred here: shipping the native dtype (e.g. bf16) halves the HBM
    # bytes of the dominant DMA; the kernel casts to f32 after the load.
    tgt2d = target.astype(jnp.int32).reshape(B, 1)

    tb = _round_up(min(block_rows, _round_up(B, 8)), 8)   # sublane multiple of 8
    num_tiles = pl.cdiv(B, tb)

    # Double-buffered pred tile dominates VMEM; cap the limit at 64 MiB so the same
    # setting is valid on v7x (64 MiB physical). v5e/v6e (128 MiB) comfortably take
    # block_rows ~256-512 for C up to ~32k f32; on v7x keep roughly half that.
    tile_bytes = tb * C * pred.dtype.itemsize
    vmem_limit = int(min(64 * 1024 * 1024,
                         max(32 * 1024 * 1024, 4 * tile_bytes + (2 << 20))))

    kernel = functools.partial(_label_smoothing_kernel,
                               num_classes=num_classes,
                               smoothing=float(smoothing),
                               total_rows=B)

    per_row = pl.pallas_call(
        kernel,
        # Padded to a whole number of tiles; padded rows are written as 0.
        out_shape=jax.ShapeDtypeStruct((num_tiles * tb, 1), jnp.float32),
        grid=(num_tiles,),
        in_specs=[
            pl.BlockSpec((tb, C), lambda i: (i, 0)),
            pl.BlockSpec((tb, 1), lambda i: (i, 0)),
        ],
        out_specs=pl.BlockSpec((tb, 1), lambda i: (i, 0)),
        compiler_params=pltpu.CompilerParams(
            dimension_semantics=("parallel",),   # tiles are independent (v7x megacore)
            vmem_limit_bytes=vmem_limit,
        ),
    )(pred, tgt2d)

    # Tiny (<= num_tiles*tb elements) final reduction in plain JAX.
    return jnp.sum(per_row) / jnp.float32(B)
    # TODO(synk): for very large vocabularies (C >= ~16k) add a second grid axis over
    # classes with an online logsumexp carried in [TB, 1] scratch ("arbitrary" axis).


def _reference_loss(pred, target, *, num_classes, smoothing=0.1):
    """Pure-JAX reference mirroring the PyTorch module, for verification."""
    confidence = 1.0 - smoothing
    smooth = jnp.full(pred.shape, smoothing / (num_classes - 1), jnp.float32)
    smooth = smooth.at[jnp.arange(pred.shape[0]), target].set(confidence)
    log_prob = jax.nn.log_softmax(pred.astype(jnp.float32), axis=1)
    return -(smooth * log_prob).sum(axis=1).mean()


if __name__ == "__main__":
    # LabelSmoothingLoss(num_classes=10, smoothing=0.1) — no trainable params.
    num_classes = 10
    smoothing = 0.1
    B = 10   # not a multiple of the 8-row tile -> exercises grid + ragged masking

    key = jax.random.PRNGKey(0)
    kp, kt = jax.random.split(key)
    pred = jax.random.normal(kp, (B, num_classes), dtype=jnp.float32)
    target = jax.random.randint(kt, (B,), 0, num_classes, dtype=jnp.int32)

    loss = label_smoothing_loss(pred, target, num_classes=num_classes,
                                smoothing=smoothing, block_rows=8)
    loss = jax.block_until_ready(loss)

    ref = _reference_loss(pred, target, num_classes=num_classes,
                          smoothing=smoothing)
    assert jnp.allclose(loss, ref, rtol=1e-5, atol=1e-5), (loss, ref)

    print("KERNEL_OK")
</pallas_src>

<mosaic_0001>
module attributes {stable_mosaic.version = 11 : i64} {
  func.func @_label_smoothing_kernel(%arg0: i32, %arg1: memref<8x10xf32, #tpu.memory_space<vmem>>, %arg2: memref<8x1xi32, #tpu.memory_space<vmem>>, %arg3: memref<8x1xf32, #tpu.memory_space<vmem>>) attributes {dimension_semantics = [#tpu.dimension_semantics<parallel>], iteration_bounds = array<i64: 2>, scalar_prefetch = 0 : i64, scratch_operands = 0 : i64, tpu.core_type = #tpu.core_type<tc>, window_params = [{transform_indices = @transform_0, window_bounds = array<i64: 8, 10>}, {transform_indices = @transform_1, window_bounds = array<i64: 8, 1>}, {transform_indices = @transform_2, window_bounds = array<i64: 8, 1>}]} {
    %c0 = arith.constant 0 : index
    %c0_0 = arith.constant 0 : index
    %0 = vector.load %arg1[%c0, %c0_0] : memref<8x10xf32, #tpu.memory_space<vmem>>, vector<8x10xf32>
    %cst = arith.constant dense<0xFF800000> : vector<8xf32>
    %1 = vector.multi_reduction <maximumf>, %0, %cst [1] : vector<8x10xf32> to vector<8xf32>
    %2 = vector.shape_cast %1 : vector<8xf32> to vector<8x1xf32>
    %3 = vector.broadcast %2 : vector<8x1xf32> to vector<8x10xf32>
    %4 = arith.subf %0, %3 : vector<8x10xf32>
    %5 = math.exp %4 : vector<8x10xf32>
    %cst_1 = arith.constant dense<0.000000e+00> : vector<8xf32>
    %6 = vector.multi_reduction <add>, %5, %cst_1 [1] : vector<8x10xf32> to vector<8xf32>
    %7 = vector.shape_cast %6 : vector<8xf32> to vector<8x1xf32>
    %8 = math.log %7 : vector<8x1xf32>
    %cst_2 = arith.constant dense<0.000000e+00> : vector<8xf32>
    %9 = vector.multi_reduction <add>, %4, %cst_2 [1] : vector<8x10xf32> to vector<8xf32>
    %10 = vector.shape_cast %9 : vector<8xf32> to vector<8x1xf32>
    %11 = tpu.iota {dimensions = array<i32: 1>} : vector<8x10xi32>
    %c0_3 = arith.constant 0 : index
    %c0_4 = arith.constant 0 : index
    %12 = vector.load %arg2[%c0_3, %c0_4] : memref<8x1xi32, #tpu.memory_space<vmem>>, vector<8x1xi32>
    %13 = vector.broadcast %12 : vector<8x1xi32> to vector<8x10xi32>
    %14 = arith.cmpi eq, %11, %13 : vector<8x10xi32>
    %cst_5 = arith.constant 0.000000e+00 : f32
    %15 = vector.broadcast %cst_5 : f32 to vector<8x10xf32>
    %16 = arith.select %14, %4, %15 : vector<8x10xi1>, vector<8x10xf32>
    %cst_6 = arith.constant dense<0.000000e+00> : vector<8xf32>
    %17 = vector.multi_reduction <add>, %16, %cst_6 [1] : vector<8x10xf32> to vector<8xf32>
    %18 = vector.shape_cast %17 : vector<8xf32> to vector<8x1xf32>
    %cst_7 = arith.constant 1.000000e+01 : f32
    %19 = vector.broadcast %cst_7 : f32 to vector<8x1xf32>
    %20 = arith.mulf %19, %8 : vector<8x1xf32>
    %21 = arith.subf %10, %20 : vector<8x1xf32>
    %cst_8 = arith.constant 0.0111111114 : f32
    %22 = vector.broadcast %cst_8 : f32 to vector<8x1xf32>
    %23 = arith.mulf %22, %21 : vector<8x1xf32>
    %cst_9 = arith.constant 0.899999976 : f32
    %cst_10 = arith.constant 0.0111111114 : f32
    %24 = arith.subf %cst_9, %cst_10 : f32
    %25 = arith.subf %18, %8 : vector<8x1xf32>
    %26 = vector.broadcast %24 : f32 to vector<8x1xf32>
    %27 = arith.mulf %26, %25 : vector<8x1xf32>
    %28 = arith.addf %23, %27 : vector<8x1xf32>
    %cst_11 = arith.constant 0.000000e+00 : f32
    %29 = vector.broadcast %cst_11 : f32 to vector<8x1xf32>
    %30 = arith.subf %29, %28 : vector<8x1xf32>
    %c8_i32 = arith.constant 8 : i32
    %31 = arith.muli %arg0, %c8_i32 : i32
    %32 = tpu.iota {dimensions = array<i32: 0>} : vector<8x1xi32>
    %33 = vector.broadcast %31 : i32 to vector<8x1xi32>
    %34 = arith.addi %33, %32 : vector<8x1xi32>
    %c10_i32 = arith.constant 10 : i32
    %35 = vector.broadcast %c10_i32 : i32 to vector<8x1xi32>
    %36 = arith.cmpi slt, %34, %35 : vector<8x1xi32>
    %cst_12 = arith.constant 0.000000e+00 : f32
    %37 = vector.broadcast %cst_12 : f32 to vector<8x1xf32>
    %38 = arith.select %36, %30, %37 : vector<8x1xi1>, vector<8x1xf32>
    %c0_13 = arith.constant 0 : index
    %c0_14 = arith.constant 0 : index
    %39 = vector.load %arg3[%c0_13, %c0_14] : memref<8x1xf32, #tpu.memory_space<vmem>>, vector<8x1xf32>
    tpu.vector_store %arg3[%c0_13, %c0_14], %38 {strides = array<i32>} : memref<8x1xf32, #tpu.memory_space<vmem>>, vector<8x1xf32>,
    return
  }
  func.func @transform_0(%arg0: i32) -> (i32, i32) {
    %c0_i32 = arith.constant 0 : i32
    %c0_i32_0 = arith.constant 0 : i32
    return %arg0, %c0_i32 : i32, i32
  }
  func.func @transform_1(%arg0: i32) -> (i32, i32) {
    %c0_i32 = arith.constant 0 : i32
    %c0_i32_0 = arith.constant 0 : i32
    return %arg0, %c0_i32 : i32, i32
  }
  func.func @transform_2(%arg0: i32) -> (i32, i32) {
    %c0_i32 = arith.constant 0 : i32
    %c0_i32_0 = arith.constant 0 : i32
    return %arg0, %c0_i32 : i32, i32
  }
}

</mosaic_0001>

<bundles_post_ra>
// kernel: tpu_custom_call.1
= control target key start
LH: loop header
LB: loop body
LE: loop exit
PB: predicated region body
PF: predicated region fallthrough
CT: control target
= control target key end

     0   :  { %s313_s9 = smov 0   ;;  %s347_s0 = inlined_call_operand.vmem [shape: f32[10,10], index: 0, kind: input, shape index: {}]   ;;  %s348_s1 = inlined_call_operand.vmem [shape: s32[10,1], index: 1, kind: input, shape index: {}]   ;;  %s349_s2 = inlined_call_operand.vmem [shape: f32[16,1], index: 2, kind: output, shape index: {}]  }
   0x1 LB: > { %s319_s10 = sadd.s32 4294967295, %s295_s9   ;;  %p268_p0 = scmp.ge.s32.totalorder %s295_s9, 1  ;;  %s295_s9 = sphi %s313_s9, %s12_s9  }
   0x2   : > { %p120_p1 = scmp.lt.s32.totalorder %s295_s9, 3 }
   0x4   : > { %p121_p2 = pnand %p268_p0, %p120_p1 }
   0x5   : > { %p144_p3 = scmp.lt.s32.totalorder (!%p121_p2), %s319_s10, 1  ;;  %s272_s19 = sshll.u32 (!%p121_p2), %s319_s10, 3 }
   0x6   : > { %124 = sbr.rel (%p121_p2) target bundleno = 340 (0x154), region = 28 }
   0xb   : > { %v297_v0 = vmov 0   ;;  %s145_s11 = scalar_select %p144_p3, %s319_s10, 1  ;;  %vm157_vm0 = vcmask 80896   ;;  %v172_v7 = vlaneseq  ;;  %v193_v22 = vstv %s272_s19 }
   0xc   : > { %284 = vset.pattern.permute.xlu0 %v297_v0  ;;  %vm197_vm3 = vcmask 7168  }
   0xd   : > { %s325_s12 = sshll.u32 %s145_s11, 3  ;;  %v173_v8 = vand.u32 127, %v172_v7  ;;  %v192_v19 = vshrl.u32 %v172_v7, 7 }
   0xe   : > { %s147_s15 = scalar_lea.vmem %s347_s0, %s325_s12  ;;  %s151_s18 = scalar_lea.vmem %s348_s1, %s325_s12 }
   0xf   : > { %v156_v1 = vld [vmem:[%s147_s15] sm:$0xff]  ;;  %v194_v25 = vadd.s32 %v193_v22, %v192_v19  ;;  %s155_s22 = scalar_lea.vmem %s349_s2, %s325_s12 }
  0x10   : > { %v158_v2 = vsel %vm157_vm0, %v156_v1, -inf  ;;  %v174_v3 = vld [vmem:[%s151_s18] sm:$0xff] }
  0x11   : > { %159 = vmax.xlane.f32.xlu0 %v158_v2  ;;  %vm195_vm2 = vcmp.lt.s32.totalorder %v194_v25, 10 }
  0x27   : > { %176 = vperm.xlu0 %284, %v174_v3  }
  0x9a   : > { %v160_v4 = vpop.xlane.xlu0 %159 }
  0x9b   : > { %v161_v5 = vsub.f32 %v156_v1, %v160_v4 }
  0x9d   : > { %v162_v6 = vmul.f32 1.442695, %v161_v5  ;;  %v169_v12 = vsel %vm157_vm0, %v161_v5, 0.0 }
  0x9f   : > { %285 = vpow2.f32 %v162_v6 }
  0xa2   : > { %v177_v10 = vpop.permute.xlu0 %176 }
  0xa3   : > { %vm178_vm1 = vcmp.eq.s32.totalorder %v173_v8, %v177_v10 }
  0xa4   : > { %v179_v13 = vsel %vm178_vm1, %v161_v5, 0.0 }
  0xa5   : > { %v180_v14 = vsel %vm157_vm0, %v179_v13, 0.0 }
  0xac   : > { %v286_v9 = vpop.eup %285 }
  0xad   : > { %v164_v11 = vsel %vm157_vm0, %v286_v9, 0.0 }
  0xae   : > { %165 = vadd.xlane.f32.xlu1 %v164_v11 }
  0xb2   : > { %170 = vadd.xlane.f32.xlu1 %v169_v12 }
  0xb6   : > { %181 = vadd.xlane.f32.xlu1 %v180_v14 }
 0x137   : > { %v166_v15 = vpop.xlane.xlu1 %165 }
 0x138   : > { %287 = vlog2.f32 %v166_v15 }
 0x13b   : > { %v171_v16 = vpop.xlane.xlu1 %170 }
 0x13f   : > { %v182_v20 = vpop.xlane.xlu1 %181 }
 0x145   : > { %v288_v17 = vpop.eup %287 }
 0x146   : > { %v168_v18 = vmul.f32 0.6931472, %v288_v17 }
 0x148   : > { %v183_v21 = vmul.f32 10.0, %v168_v18  ;;  %v186_v23 = vsub.f32 %v182_v20, %v168_v18 }
 0x14a   : > { %v184_v24 = vsub.f32 %v171_v16, %v183_v21  ;;  %v187_v27 = vmul.f32 0.88888884, %v186_v23 }
 0x14c   : > { %v185_v26 = vmul.f32 0.011111111, %v184_v24 }
 0x14e   : > { %v188_v28 = vadd.f32 %v187_v27, %v185_v26 }
 0x150   : > { %v189_v29 = vsub.f32 0.0, %v188_v28 }
 0x152   : > { %v196_v30 = vsel %vm195_vm2, %v189_v29, 0.0 }
 0x153   : > { %198 = vst.msk [vmem:[%s155_s22] sm:$0xff] %vm197_vm3, %v196_v30 }
 0x154 PF: > { %s12_s9 = sadd.s32 1, %s295_s9  }
 0x155   : > { %p9_p4 = scmp.ge.s32.totalorder %s12_s9, 4  }
 0x157   :  { %11 = sbr.rel (!%p9_p4) target bundleno = 1 (0x1), region = 61 }

</bundles_post_ra>
